<compile_context>
chip_gen: v6e
topology: v6e:2x2x1
jax: 0.10.0
libtpu: 0.0.40
codegen_flags: <defaults>
</compile_context>

<pallas_src>
import jax
import jax.numpy as jnp
from jax.experimental import pallas as pl
from jax.experimental.pallas import tpu as pltpu

N_STATES = 4      # CartPole-v0 observation dim
N_ACTIONS = 2     # CartPole-v0 action dim
HIDDEN = 50

# Lane/sublane-aligned (padded) sizes.
S_PAD = 8         # N_STATES padded to one sublane group
H_PAD = 128       # HIDDEN padded to one full lane width
A_PAD = 128       # N_ACTIONS padded to one full lane width (lane-dense output)

MAX_TB = 512      # max batch rows per grid step (working set stays tiny in VMEM)


def _round_up(n, m):
    return ((n + m - 1) // m) * m


def dqn_kernel(x_ref, w1_ref, b1_ref, w2_ref, b2_ref, out_ref):
    # x: [TB, S_PAD], w1: [S_PAD, H_PAD], b1: [1, H_PAD]
    # w2: [H_PAD, A_PAD], b2: [1, A_PAD], out: [TB, A_PAD]
    x = x_ref[...]
    h = jnp.dot(x, w1_ref[...], preferred_element_type=jnp.float32) + b1_ref[...]
    h = jnp.maximum(h, 0.0)                                   # F.relu
    q = jnp.dot(h, w2_ref[...], preferred_element_type=jnp.float32) + b2_ref[...]
    out_ref[...] = q.astype(out_ref.dtype)


def prepare_params(w1, b1, w2, b2):
    """One-time prep. Takes PyTorch-layout params:
         w1: [HIDDEN, N_STATES], b1: [HIDDEN], w2: [N_ACTIONS, HIDDEN], b2: [N_ACTIONS]
       Returns padded [in, out] weights and 2-D biases (padded entries are 0, so
       relu(0)=0 and zero rows of w2 keep the result exactly equal to the unpadded net)."""
    w1_p = jnp.zeros((S_PAD, H_PAD), jnp.float32).at[:N_STATES, :HIDDEN].set(w1.T)
    b1_p = jnp.zeros((1, H_PAD), jnp.float32).at[0, :HIDDEN].set(b1)
    w2_p = jnp.zeros((H_PAD, A_PAD), jnp.float32).at[:HIDDEN, :N_ACTIONS].set(w2.T)
    b2_p = jnp.zeros((1, A_PAD), jnp.float32).at[0, :N_ACTIONS].set(b2)
    return w1_p, b1_p, w2_p, b2_p


def dqn_forward(x, w1_p, b1_p, w2_p, b2_p):
    """x: [B, N_STATES] f32; remaining args come from prepare_params()."""
    B = x.shape[0]
    TB = MAX_TB if B >= MAX_TB else _round_up(B, 8)
    B_pad = _round_up(B, TB)

    # Zero-pad batch and feature dims (zeros contribute nothing to the matmuls).
    x_p = jnp.zeros((B_pad, S_PAD), jnp.float32).at[:B, :N_STATES].set(x)

    out = pl.pallas_call(
        dqn_kernel,
        out_shape=jax.ShapeDtypeStruct((B_pad, A_PAD), jnp.float32),
        grid_spec=pl.GridSpec(
            grid=(B_pad // TB,),
            in_specs=[
                pl.BlockSpec((TB, S_PAD), lambda i: (i, 0)),
                pl.BlockSpec((S_PAD, H_PAD), lambda i: (0, 0)),
                pl.BlockSpec((1, H_PAD), lambda i: (0, 0)),
                pl.BlockSpec((H_PAD, A_PAD), lambda i: (0, 0)),
                pl.BlockSpec((1, A_PAD), lambda i: (0, 0)),
            ],
            out_specs=pl.BlockSpec((TB, A_PAD), lambda i: (i, 0)),
        ),
        compiler_params=pltpu.CompilerParams(
            # Batch tiles are independent -> shard across v7x's 2 TCs; no-op on v5e/v6e.
            dimension_semantics=("parallel",)),
    )(x_p, w1_p, b1_p, w2_p, b2_p)

    return out[:B, :N_ACTIONS]


def reference_forward(x, w1, b1, w2, b2):
    h = jnp.maximum(x @ w1.T + b1, 0.0)
    return h @ w2.T + b2


if __name__ == "__main__":
    key = jax.random.PRNGKey(0)
    k_x, k_w1, k_b1, k_w2, k_b2 = jax.random.split(key, 5)

    B = 2
    x = jax.random.normal(k_x, (B, N_STATES), dtype=jnp.float32)

    # Deterministic init matching the module's __init__ shapes:
    # weights ~ N(0, 0.1); biases ~ U(-1/sqrt(fan_in), 1/sqrt(fan_in)) (torch default).
    w1 = 0.1 * jax.random.normal(k_w1, (HIDDEN, N_STATES), dtype=jnp.float32)
    b1 = jax.random.uniform(k_b1, (HIDDEN,), dtype=jnp.float32,
                            minval=-1.0 / jnp.sqrt(N_STATES),
                            maxval=1.0 / jnp.sqrt(N_STATES))
    w2 = 0.1 * jax.random.normal(k_w2, (N_ACTIONS, HIDDEN), dtype=jnp.float32)
    b2 = jax.random.uniform(k_b2, (N_ACTIONS,), dtype=jnp.float32,
                            minval=-1.0 / jnp.sqrt(HIDDEN),
                            maxval=1.0 / jnp.sqrt(HIDDEN))

    # One-time weight prep (hoisted out of the per-call hot path).
    params = prepare_params(w1, b1, w2, b2)
    params = jax.tree_util.tree_map(jax.block_until_ready, params)

    fwd = jax.jit(dqn_forward)
    q = fwd(x, *params)
    jax.block_until_ready(q)

    q_ref = reference_forward(x, w1, b1, w2, b2)
    assert q.shape == (B, N_ACTIONS)
    assert jnp.allclose(q, q_ref, atol=1e-5, rtol=1e-5), (q, q_ref)

    # Also sanity-check a larger (multi-tile) batch to exercise the grid path.
    B2 = 1024 + 3
    x_big = jax.random.normal(k_x, (B2, N_STATES), dtype=jnp.float32)
    q_big = fwd(x_big, *params)
    jax.block_until_ready(q_big)
    assert q_big.shape == (B2, N_ACTIONS)
    assert jnp.allclose(q_big, reference_forward(x_big, w1, b1, w2, b2),
                        atol=1e-5, rtol=1e-5)

    print("KERNEL_OK")
</pallas_src>

<mosaic_0001>
module attributes {stable_mosaic.version = 11 : i64} {
  func.func @dqn_kernel(%arg0: i32, %arg1: memref<8x8xf32, #tpu.memory_space<vmem>>, %arg2: memref<8x128xf32, #tpu.memory_space<vmem>>, %arg3: memref<1x128xf32, #tpu.memory_space<vmem>>, %arg4: memref<128x128xf32, #tpu.memory_space<vmem>>, %arg5: memref<1x128xf32, #tpu.memory_space<vmem>>, %arg6: memref<8x128xf32, #tpu.memory_space<vmem>>) attributes {dimension_semantics = [#tpu.dimension_semantics<parallel>], iteration_bounds = array<i64: 1>, scalar_prefetch = 0 : i64, scratch_operands = 0 : i64, tpu.core_type = #tpu.core_type<tc>, window_params = [{transform_indices = @transform_0, window_bounds = array<i64: 8, 8>}, {pipeline_mode = #tpu.pipeline_mode<synchronous>, transform_indices = @transform_1, window_bounds = array<i64: 8, 128>}, {pipeline_mode = #tpu.pipeline_mode<synchronous>, transform_indices = @transform_2, window_bounds = array<i64: 1, 128>}, {pipeline_mode = #tpu.pipeline_mode<synchronous>, transform_indices = @transform_3, window_bounds = array<i64: 128, 128>}, {pipeline_mode = #tpu.pipeline_mode<synchronous>, transform_indices = @transform_4, window_bounds = array<i64: 1, 128>}, {transform_indices = @transform_5, window_bounds = array<i64: 8, 128>}]} {
    %c0 = arith.constant 0 : index
    %c0_0 = arith.constant 0 : index
    %0 = vector.load %arg1[%c0, %c0_0] : memref<8x8xf32, #tpu.memory_space<vmem>>, vector<8x8xf32>
    %c0_1 = arith.constant 0 : index
    %c0_2 = arith.constant 0 : index
    %1 = vector.load %arg2[%c0_1, %c0_2] : memref<8x128xf32, #tpu.memory_space<vmem>>, vector<8x128xf32>
    %cst = arith.constant dense<0.000000e+00> : vector<8x128xf32>
    %2 = tpu.matmul %0, %1, %cst {dimension_numbers = #tpu.dot_dimension_numbers<[1], [0], [0], [1], [0, 0, 1, 1], [], []>} : vector<8x8xf32>, vector<8x128xf32>, vector<8x128xf32> -> vector<8x128xf32>
    %c0_3 = arith.constant 0 : index
    %c0_4 = arith.constant 0 : index
    %3 = vector.load %arg3[%c0_3, %c0_4] : memref<1x128xf32, #tpu.memory_space<vmem>>, vector<1x128xf32>
    %4 = vector.broadcast %3 : vector<1x128xf32> to vector<8x128xf32>
    %5 = arith.addf %2, %4 : vector<8x128xf32>
    %cst_5 = arith.constant 0.000000e+00 : f32
    %6 = vector.broadcast %cst_5 : f32 to vector<8x128xf32>
    %7 = arith.maximumf %5, %6 : vector<8x128xf32>
    %c0_6 = arith.constant 0 : index
    %c0_7 = arith.constant 0 : index
    %8 = vector.load %arg4[%c0_6, %c0_7] : memref<128x128xf32, #tpu.memory_space<vmem>>, vector<128x128xf32>
    %cst_8 = arith.constant dense<0.000000e+00> : vector<8x128xf32>
    %9 = tpu.matmul %7, %8, %cst_8 {dimension_numbers = #tpu.dot_dimension_numbers<[1], [0], [0], [1], [0, 0, 1, 1], [], []>} : vector<8x128xf32>, vector<128x128xf32>, vector<8x128xf32> -> vector<8x128xf32>
    %c0_9 = arith.constant 0 : index
    %c0_10 = arith.constant 0 : index
    %10 = vector.load %arg5[%c0_9, %c0_10] : memref<1x128xf32, #tpu.memory_space<vmem>>, vector<1x128xf32>
    %11 = vector.broadcast %10 : vector<1x128xf32> to vector<8x128xf32>
    %12 = arith.addf %9, %11 : vector<8x128xf32>
    %c0_11 = arith.constant 0 : index
    %c0_12 = arith.constant 0 : index
    %13 = vector.load %arg6[%c0_11, %c0_12] : memref<8x128xf32, #tpu.memory_space<vmem>>, vector<8x128xf32>
    tpu.vector_store %arg6[%c0_11, %c0_12], %12 {strides = array<i32>} : memref<8x128xf32, #tpu.memory_space<vmem>>, vector<8x128xf32>,
    return
  }
  func.func @transform_0(%arg0: i32) -> (i32, i32) {
    %c0_i32 = arith.constant 0 : i32
    %c0_i32_0 = arith.constant 0 : i32
    return %arg0, %c0_i32 : i32, i32
  }
  func.func @transform_1(%arg0: i32) -> (i32, i32) {
    %c0_i32 = arith.constant 0 : i32
    %c0_i32_0 = arith.constant 0 : i32
    %c0_i32_1 = arith.constant 0 : i32
    return %c0_i32, %c0_i32_0 : i32, i32
  }
  func.func @transform_2(%arg0: i32) -> (i32, i32) {
    %c0_i32 = arith.constant 0 : i32
    %c0_i32_0 = arith.constant 0 : i32
    %c0_i32_1 = arith.constant 0 : i32
    return %c0_i32, %c0_i32_0 : i32, i32
  }
  func.func @transform_3(%arg0: i32) -> (i32, i32) {
    %c0_i32 = arith.constant 0 : i32
    %c0_i32_0 = arith.constant 0 : i32
    %c0_i32_1 = arith.constant 0 : i32
    return %c0_i32, %c0_i32_0 : i32, i32
  }
  func.func @transform_4(%arg0: i32) -> (i32, i32) {
    %c0_i32 = arith.constant 0 : i32
    %c0_i32_0 = arith.constant 0 : i32
    %c0_i32_1 = arith.constant 0 : i32
    return %c0_i32, %c0_i32_0 : i32, i32
  }
  func.func @transform_5(%arg0: i32) -> (i32, i32) {
    %c0_i32 = arith.constant 0 : i32
    %c0_i32_0 = arith.constant 0 : i32
    return %arg0, %c0_i32 : i32, i32
  }
}

</mosaic_0001>

<bundles_post_ra>
// kernel: dqn_forward.1
= control target key start
LH: loop header
LB: loop body
LE: loop exit
PB: predicated region body
PF: predicated region fallthrough
CT: control target
= control target key end

     0   :  { %10 = vsyncpa [#allocation3], 0  ;;  %s306_s18 = smov [#allocation2]   ;;  %s359_s0 = inlined_call_operand.vmem [shape: f32[8,8], index: 0, kind: input, shape index: {}]   ;;  %s360_s1 = inlined_call_operand.vmem [shape: f32[8,128], index: 1, kind: input, shape index: {}]   ;;  %s361_s2 = inlined_call_operand.vmem [shape: f32[1,128], index: 2, kind: input, shape index: {}]   ;;  %s362_s3 = inlined_call_operand.hbm [shape: f32[128,128], index: 3, kind: input, shape index: {}]   ;;  %s363_s4 = inlined_call_operand.vmem [shape: f32[1,128], index: 4, kind: input, shape index: {}]   ;;  %s364_s5 = inlined_call_operand.vmem [shape: f32[8,128], index: 5, kind: output, shape index: {}]  }
   0x1   :  { %s22_s19 = sshll.u32 %s306_s18, 4  ;;  %s23_s19 = int_to_ptr.vmem [resolvable:$true] %s22_s19 }
   0x2   :  { %s292_s20 = scalar_lea.vmem %s23_s19, 2048  ;;  %p297_p1 = scmp.lt.s32.totalorder %s23_s19, %s23_s19 }
   0x3   :  { %p293_p0 = scmp.ne.s32.totalorder %s23_s19, %s292_s20  ;;  %p298_p2 = scmp.lt.s32.totalorder %s292_s20, %s292_s20 }
   0x5   :  { %p299_p3 = por %p298_p2, %p297_p1 }
   0x7   :  { %p300_p4 = pnand %p299_p3, %p293_p0 }
   0x9   :  { %303 = shalt.err (!%p300_p4)
}
   0xa   :  { %s307_s21 = smov 128   ;;  %s308_s22 = smov 8  }
   0xb   :  { %28 = dma.hbm_to_vmem [thread:$0]  %s362_s3, 2048, %s23_s19, [#allocation3], %s307_s21, %s307_s21, %s308_s22  }
   0xc   :  { %304 = dma.done.wait [#allocation3], 2048  }
   0xd   :  { %305 = vsyncadd [#allocation3], 4294965248  ;;  %v309_v0 = vmov 0.0   ;;  %vm310_vm0 = vmmov 0   ;;  %vm43_vm1 = vcmask 64512   ;;  %v35_v1 = vld [vmem:[%s360_s1] sm:$0xff] }
   0xe   :  { %239 = vmatprep.subr.mxu0 %v309_v0  ;;  %241 = vmatprep.mubr.msk.f32.mxu0 %vm310_vm0, %v309_v0  ;;  %v34_v2 = vld [vmem:[%s359_s0] sm:$0xff]  ;;  %v133_v3 = vld [vmem:[#allocation2 + $0x78] sm:$0xff]  ;;  %v132_v4 = vld [vmem:[#allocation2 + $0x70] sm:$0xff] }
   0xf   :  { %244 = vmatprep.subr.mxu1 %v309_v0  ;;  %276 = vmatprep.mubr.msk.f32.mxu1 %vm310_vm0, %v309_v0  ;;  %v131_v5 = vld [vmem:[#allocation2 + $0x68] sm:$0xff]  ;;  %v130_v6 = vld [vmem:[#allocation2 + $0x60] sm:$0xff]  ;;  %v129_v7 = vld [vmem:[#allocation2 + $0x58] sm:$0xff] }
  0x10   :  { %240 = vmatpush3.msra.mxu0 %v35_v1  ;;  %245 = vmatpush3.msra.mxu1 %v133_v3  ;;  %v128_v8 = vld [vmem:[#allocation2 + $0x50] sm:$0xff]  ;;  %v127_v9 = vld [vmem:[#allocation2 + $0x48] sm:$0xff]  ;;  %v126_v10 = vld [vmem:[#allocation2 + $0x40] sm:$0xff] }
  0x11   :  { %242 = vmatmul.mubr.msk.f32.vlgmr.msra.gmra.mxu0 %vm43_vm1, %v34_v2  ;;  %246 = vmatprep.subr.mxu1 %v309_v0  ;;  %v125_v11 = vld [vmem:[#allocation2 + $0x38] sm:$0xff]  ;;  %v124_v12 = vld [vmem:[#allocation2 + $0x30] sm:$0xff]  ;;  %v123_v13 = vld [vmem:[#allocation2 + $0x28] sm:$0xff] }
  0x12   :  { %247 = vmatpush3.msra.mxu1 %v132_v4  ;;  %v122_v14 = vld [vmem:[#allocation2 + $0x20] sm:$0xff]  ;;  %v121_v15 = vld [vmem:[#allocation2 + $0x18] sm:$0xff]  ;;  %v120_v16 = vld [vmem:[#allocation2 + $0x10] sm:$0xff] }
  0x13   :  { %248 = vmatprep.subr.mxu1 %v309_v0  ;;  %v119_v17 = vld [vmem:[#allocation2 + $0x8] sm:$0xff]  ;;  %v118_v18 = vld [vmem:[#allocation2] sm:$0xff] }
  0x14   :  { %249 = vmatpush3.msra.mxu1 %v131_v5  ;;  %v217_v19 = vld [vmem:[%s361_s2] ss:$0 sm:$0xff] }
  0x15   :  { %250 = vmatprep.subr.mxu1 %v309_v0  ;;  %v219_v24 = vld [vmem:[%s363_s4] ss:$0 sm:$0xff] }
  0x16   :  { %251 = vmatpush3.msra.mxu1 %v130_v6 }
  0x17   :  { %252 = vmatprep.subr.mxu1 %v309_v0 }
  0x18   :  { %253 = vmatpush3.msra.mxu1 %v129_v7 }
  0x19   :  { %254 = vmatprep.subr.mxu1 %v309_v0 }
  0x1a   :  { %255 = vmatpush3.msra.mxu1 %v128_v8 }
  0x1b   :  { %256 = vmatprep.subr.mxu1 %v309_v0 }
  0x1c   :  { %257 = vmatpush3.msra.mxu1 %v127_v9 }
  0x1d   :  { %258 = vmatprep.subr.mxu1 %v309_v0 }
  0x1e   :  { %259 = vmatpush3.msra.mxu1 %v126_v10 }
  0x1f   :  { %260 = vmatprep.subr.mxu1 %v309_v0 }
  0x20   :  { %261 = vmatpush3.msra.mxu1 %v125_v11 }
  0x21   :  { %262 = vmatprep.subr.mxu1 %v309_v0 }
  0x22   :  { %263 = vmatpush3.msra.mxu1 %v124_v12 }
  0x23   :  { %264 = vmatprep.subr.mxu1 %v309_v0 }
  0x24   :  { %265 = vmatpush3.msra.mxu1 %v123_v13 }
  0x25   :  { %266 = vmatprep.subr.mxu1 %v309_v0 }
  0x26   :  { %267 = vmatpush3.msra.mxu1 %v122_v14 }
  0x27   :  { %268 = vmatprep.subr.mxu1 %v309_v0 }
  0x28   :  { %269 = vmatpush3.msra.mxu1 %v121_v15 }
  0x29   :  { %270 = vmatprep.subr.mxu1 %v309_v0 }
  0x2a   :  { %271 = vmatpush3.msra.mxu1 %v120_v16 }
  0x2b   :  { %272 = vmatprep.subr.mxu1 %v309_v0 }
  0x2c   :  { %273 = vmatpush3.msra.mxu1 %v119_v17 }
  0x2d   :  { %274 = vmatprep.subr.mxu1 %v309_v0 }
  0x2e   :  { %275 = vmatpush3.msra.mxu1 %v118_v18 }
  0xd1   :  { %v113_v20 = vpop.f32.mrf.mxu0 }
  0xd2   :  { %v114_v21 = vadd.f32 %v217_v19, %v113_v20 }
  0xd3   :  { %v243_v22 = vpop.f32.mrf.mxu0 }
  0xd4   :  { %v117_v23 = vmax.f32 %v114_v21, 0.0 }
  0xd6   :  { %277 = vmatmul.mubr.f32.vlgmr.msra.gmra.mxu1 %v117_v23 }
 0x196   :  { %v207_v25 = vpop.f32.mrf.mxu1 }
 0x197   :  { %v208_v26 = vadd.f32 %v219_v24, %v207_v25 }
 0x198   :  { %v278_v27 = vpop.f32.mrf.mxu1 }
 0x199   :  { %211 = vst [vmem:[%s364_s5] sm:$0xff] %v208_v26 }
 0x19a   :  { %216 = vsyncpa [#allocation3], 1 }

</bundles_post_ra>
